<compile_context>
chip_gen: v7x
topology: tpu7x:2x2x1
jax: 0.10.0
libtpu: 0.0.40
codegen_flags: <defaults>
</compile_context>

<pallas_src>
import jax
import jax.numpy as jnp
from jax import lax
from jax.experimental import pallas as pl
from jax.experimental.pallas import tpu as pltpu


def _bilstm_kernel(len_ref, gx_ref, wh_ref, out_ref):
    """Single invocation: whole bidirectional recurrence in one fori_loop.

    len_ref : SMEM (B,) int32   -- sequence lengths (sorted descending)
    gx_ref  : VMEM (T, B, 8H)   -- precomputed X@W_ih + bias, cols [:4H]=fwd, [4H:]=bwd
    wh_ref  : VMEM (2H, 8H)     -- block-diagonal recurrent weight [[Wh_f,0],[0,Wh_b]]
    out_ref : VMEM (T, B, 2H)   -- output, cols [:H]=fwd, [H:]=bwd
    """
    T, B, H2 = out_ref.shape
    H = H2 // 2

    # Padded rows (t >= max_len) stay zero.
    out_ref[...] = jnp.zeros_like(out_ref)

    n = len_ref[0]                      # max length (lengths sorted descending)
    wh = wh_ref[...]                    # (2H, 8H), loop-invariant

    # Per-batch lengths as a (B, H) vector for masking (built from SMEM scalars).
    row = lax.broadcasted_iota(jnp.int32, (B, H), 0)
    lenv = jnp.zeros((B, H), jnp.int32)
    for b in range(B):                  # B is small & static
        lenv = jnp.where(row == b, len_ref[b], lenv)

    # Column selector: fwd precomputed gates live in cols [0,4H), bwd in [4H,8H).
    col = lax.broadcasted_iota(jnp.int32, (B, 8 * H), 1)
    col_is_fwd = col < 4 * H

    z = jnp.zeros((B, H), jnp.float32)

    def step(s, carry):
        hf, cf, hb, cb = carry
        tb = n - 1 - s                  # backward time index

        # One fused recurrent matmul for both directions.
        h2 = jnp.concatenate([hf, hb], axis=-1)                  # (B, 2H)
        gx_t = jnp.where(col_is_fwd, gx_ref[s], gx_ref[tb])      # (B, 8H)
        gates = gx_t + jnp.dot(h2, wh, preferred_element_type=jnp.float32)

        # ---- forward direction (time s) ----
        i = jax.nn.sigmoid(gates[:, 0 * H:1 * H])
        f = jax.nn.sigmoid(gates[:, 1 * H:2 * H])
        g = jnp.tanh(gates[:, 2 * H:3 * H])
        o = jax.nn.sigmoid(gates[:, 3 * H:4 * H])
        cf_new = f * cf + i * g
        hf_new = o * jnp.tanh(cf_new)
        mf = lenv > s
        hf = jnp.where(mf, hf_new, hf)
        cf = jnp.where(mf, cf_new, cf)
        out_ref[s, :, 0:H] = jnp.where(mf, hf, 0.0)

        # ---- backward direction (time tb = n-1-s) ----
        i = jax.nn.sigmoid(gates[:, 4 * H:5 * H])
        f = jax.nn.sigmoid(gates[:, 5 * H:6 * H])
        g = jnp.tanh(gates[:, 6 * H:7 * H])
        o = jax.nn.sigmoid(gates[:, 7 * H:8 * H])
        cb_new = f * cb + i * g
        hb_new = o * jnp.tanh(cb_new)
        mb = lenv > tb
        hb = jnp.where(mb, hb_new, hb)
        cb = jnp.where(mb, cb_new, cb)
        out_ref[tb, :, H:2 * H] = jnp.where(mb, hb, 0.0)

        return hf, cf, hb, cb

    lax.fori_loop(0, n, step, (z, z, z, z))


def bilstm_forward(feats, seq_lengths, params):
    """feats: (B, T, D) f32, seq_lengths: (B,) int32 (sorted descending).
       Returns (B, T, 2H) f32 — same as pad_packed_sequence(lstm(pack(...)))."""
    B, T, D = feats.shape
    H = params["wh_f"].shape[0]

    x_tm = jnp.transpose(feats, (1, 0, 2))                       # (T, B, D)

    # Hoisted input projection for both directions: one GEMM, bias folded in.
    wi_cat = jnp.concatenate([params["wi_f"], params["wi_b"]], axis=1)   # (D, 8H)
    b_cat = jnp.concatenate([params["b_f"], params["b_b"]], axis=1)      # (1, 8H)
    gx = jnp.einsum("tbd,dg->tbg", x_tm, wi_cat) + b_cat         # (T, B, 8H)

    # Block-diagonal recurrent weight: [h_f | h_b] @ Wh_bd -> [gates_f | gates_b].
    wh_bd = jnp.zeros((2 * H, 8 * H), jnp.float32)
    wh_bd = wh_bd.at[:H, :4 * H].set(params["wh_f"])
    wh_bd = wh_bd.at[H:, 4 * H:].set(params["wh_b"])

    lens = seq_lengths.astype(jnp.int32)                         # (B,)

    out_tm = pl.pallas_call(
        _bilstm_kernel,
        out_shape=jax.ShapeDtypeStruct((T, B, 2 * H), jnp.float32),
        grid_spec=pltpu.PrefetchScalarGridSpec(
            num_scalar_prefetch=1,            # lens -> SMEM (loop bound + masks)
            grid=(1,),                        # single invocation; loop is in-kernel
            in_specs=[
                pl.BlockSpec((T, B, 8 * H), lambda i, lens: (0, 0, 0)),  # gx
                pl.BlockSpec((2 * H, 8 * H), lambda i, lens: (0, 0)),    # Wh block-diag
            ],
            out_specs=pl.BlockSpec((T, B, 2 * H), lambda i, lens: (0, 0, 0)),
        ),
        compiler_params=pltpu.CompilerParams(
            dimension_semantics=("arbitrary",)),
    )(lens, gx, wh_bd)

    # Tiny final permute back to the PyTorch batch-first convention.
    return jnp.transpose(out_tm, (1, 0, 2))                      # (B, T, 2H)


def bilstm_ref(feats, seq_lengths, params):
    """Pure-JAX reference with identical packed-sequence semantics."""
    B, T, D = feats.shape
    H = params["wh_f"].shape[0]
    lens = seq_lengths.reshape(B, 1)

    def cell(x, h, c, wi, wh, b):
        gates = x @ wi + h @ wh + b
        i = jax.nn.sigmoid(gates[:, :H])
        f = jax.nn.sigmoid(gates[:, H:2 * H])
        g = jnp.tanh(gates[:, 2 * H:3 * H])
        o = jax.nn.sigmoid(gates[:, 3 * H:])
        c_new = f * c + i * g
        return o * jnp.tanh(c_new), c_new

    hf = jnp.zeros((B, H), jnp.float32); cf = jnp.zeros((B, H), jnp.float32)
    hb = jnp.zeros((B, H), jnp.float32); cb = jnp.zeros((B, H), jnp.float32)
    out_f, out_b = [], [None] * T
    for t in range(T):
        hn, cn = cell(feats[:, t], hf, cf, params["wi_f"], params["wh_f"], params["b_f"])
        m = lens > t
        hf = jnp.where(m, hn, hf); cf = jnp.where(m, cn, cf)
        out_f.append(jnp.where(m, hf, 0.0))
    for t in range(T - 1, -1, -1):
        hn, cn = cell(feats[:, t], hb, cb, params["wi_b"], params["wh_b"], params["b_b"])
        m = lens > t
        hb = jnp.where(m, hn, hb); cb = jnp.where(m, cn, cb)
        out_b[t] = jnp.where(m, hb, 0.0)
    return jnp.concatenate([jnp.stack(out_f, 1), jnp.stack(out_b, 1)], axis=-1)


def make_params(key, D, H):
    """Deterministic params mirroring nn.LSTM shapes + init_ortho (orthogonal 2D weights)."""
    ks = jax.random.split(key, 8)
    ortho = jax.nn.initializers.orthogonal()
    w_ih_f = ortho(ks[0], (4 * H, D), jnp.float32)       # torch: weight_ih_l0
    w_hh_f = ortho(ks[1], (4 * H, H), jnp.float32)       # torch: weight_hh_l0
    w_ih_b = ortho(ks[2], (4 * H, D), jnp.float32)       # torch: weight_ih_l0_reverse
    w_hh_b = ortho(ks[3], (4 * H, H), jnp.float32)       # torch: weight_hh_l0_reverse
    bound = 1.0 / jnp.sqrt(H)
    b_ih_f = jax.random.uniform(ks[4], (4 * H,), jnp.float32, -bound, bound)
    b_hh_f = jax.random.uniform(ks[5], (4 * H,), jnp.float32, -bound, bound)
    b_ih_b = jax.random.uniform(ks[6], (4 * H,), jnp.float32, -bound, bound)
    b_hh_b = jax.random.uniform(ks[7], (4 * H,), jnp.float32, -bound, bound)
    return {
        "wi_f": w_ih_f.T, "wh_f": w_hh_f.T, "b_f": (b_ih_f + b_hh_f).reshape(1, 4 * H),
        "wi_b": w_ih_b.T, "wh_b": w_hh_b.T, "b_b": (b_ih_b + b_hh_b).reshape(1, 4 * H),
    }


if __name__ == "__main__":
    # config: embed_dim=12, mask_dim=4 -> input D=16; l_hidden_size=32 -> H=16;
    # l_num_layers=2 -> num_layers=1 (bidirectional).
    B, T = 2, 8
    embed_dim, mask_dim, l_hidden_size = 12, 4, 32
    D = embed_dim + mask_dim
    H = l_hidden_size // 2

    key = jax.random.PRNGKey(0)
    k_feat, k_par = jax.random.split(key)
    feats = jax.random.normal(k_feat, (B, T, D), jnp.float32)
    # pack_padded_sequence requires descending-sorted lengths
    seq_lengths = jnp.array([8, 5], dtype=jnp.int32)

    params = make_params(k_par, D, H)

    out = bilstm_forward(feats, seq_lengths, params)
    out = jax.block_until_ready(out)

    ref = bilstm_ref(feats, seq_lengths, params)
    assert out.shape == (B, T, 2 * H), out.shape
    assert jnp.allclose(out, ref, atol=1e-5, rtol=1e-5), float(jnp.max(jnp.abs(out - ref)))

    print("KERNEL_OK")
</pallas_src>

<mosaic_0001>
module attributes {stable_mosaic.version = 11 : i64} {
  func.func @_bilstm_kernel(%arg0: i32, %arg1: memref<2xi32, #tpu.memory_space<smem>>, %arg2: memref<8x2x128xf32, #tpu.memory_space<vmem>>, %arg3: memref<32x128xf32, #tpu.memory_space<vmem>>, %arg4: memref<8x2x32xf32, #tpu.memory_space<vmem>>) attributes {dimension_semantics = [#tpu.dimension_semantics<arbitrary>], iteration_bounds = array<i64: 1>, scalar_prefetch = 1 : i64, scratch_operands = 0 : i64, tpu.core_type = #tpu.core_type<tc>, window_params = [{pipeline_mode = #tpu.pipeline_mode<synchronous>, transform_indices = @transform_0, window_bounds = array<i64: 8, 2, 128>}, {pipeline_mode = #tpu.pipeline_mode<synchronous>, transform_indices = @transform_1, window_bounds = array<i64: 32, 128>}, {pipeline_mode = #tpu.pipeline_mode<synchronous>, transform_indices = @transform_2, window_bounds = array<i64: 8, 2, 32>}]} {
    %cst = arith.constant 0.000000e+00 : f32
    %0 = vector.broadcast %cst : f32 to vector<8x2x32xf32>
    %c0 = arith.constant 0 : index
    %c0_0 = arith.constant 0 : index
    %c0_1 = arith.constant 0 : index
    %1 = vector.load %arg4[%c0, %c0_0, %c0_1] : memref<8x2x32xf32, #tpu.memory_space<vmem>>, vector<8x2x32xf32>
    tpu.vector_store %arg4[%c0, %c0_0, %c0_1], %0 {strides = array<i32>} : memref<8x2x32xf32, #tpu.memory_space<vmem>>, vector<8x2x32xf32>,
    %c0_2 = arith.constant 0 : index
    %2 = memref.load %arg1[%c0_2] : memref<2xi32, #tpu.memory_space<smem>>
    %c0_3 = arith.constant 0 : index
    %c0_4 = arith.constant 0 : index
    %3 = vector.load %arg3[%c0_3, %c0_4] : memref<32x128xf32, #tpu.memory_space<vmem>>, vector<32x128xf32>
    %4 = tpu.iota {dimensions = array<i32: 0>} : vector<2x16xi32>
    %c0_i32 = arith.constant 0 : i32
    %5 = vector.broadcast %c0_i32 : i32 to vector<2x16xi32>
    %c0_i32_5 = arith.constant 0 : i32
    %6 = vector.broadcast %c0_i32_5 : i32 to vector<2x16xi32>
    %7 = arith.cmpi eq, %4, %6 : vector<2x16xi32>
    %c0_6 = arith.constant 0 : index
    %8 = memref.load %arg1[%c0_6] : memref<2xi32, #tpu.memory_space<smem>>
    %9 = vector.broadcast %8 : i32 to vector<2x16xi32>
    %10 = arith.select %7, %9, %5 : vector<2x16xi1>, vector<2x16xi32>
    %c1_i32 = arith.constant 1 : i32
    %11 = vector.broadcast %c1_i32 : i32 to vector<2x16xi32>
    %12 = arith.cmpi eq, %4, %11 : vector<2x16xi32>
    %c1 = arith.constant 1 : index
    %13 = memref.load %arg1[%c1] : memref<2xi32, #tpu.memory_space<smem>>
    %14 = vector.broadcast %13 : i32 to vector<2x16xi32>
    %15 = arith.select %12, %14, %10 : vector<2x16xi1>, vector<2x16xi32>
    %16 = tpu.iota {dimensions = array<i32: 1>} : vector<2x128xi32>
    %c64_i32 = arith.constant 64 : i32
    %17 = vector.broadcast %c64_i32 : i32 to vector<2x128xi32>
    %18 = arith.cmpi slt, %16, %17 : vector<2x128xi32>
    %cst_7 = arith.constant 0.000000e+00 : f32
    %19 = vector.broadcast %cst_7 : f32 to vector<2x16xf32>
    %c0_i32_8 = arith.constant 0 : i32
    %20 = arith.subi %2, %c0_i32_8 : i32
    %21 = arith.addi %c0_i32_8, %20 : i32
    %c1_i32_9 = arith.constant 1 : i32
    %22:4 = scf.for %arg5 = %c0_i32_8 to %21 step %c1_i32_9 iter_args(%arg6 = %19, %arg7 = %19, %arg8 = %19, %arg9 = %19) -> (vector<2x16xf32>, vector<2x16xf32>, vector<2x16xf32>, vector<2x16xf32>)  : i32 {
      %c1_i32_10 = arith.constant 1 : i32
      %23 = arith.subi %2, %c1_i32_10 : i32
      %24 = arith.subi %23, %arg5 : i32
      %25 = tpu.concatenate %arg6, %arg8 in 1 : vector<2x16xf32>, vector<2x16xf32> -> vector<2x32xf32>
      %26 = arith.index_cast %arg5 : i32 to index
      %c0_11 = arith.constant 0 : index
      %c0_12 = arith.constant 0 : index
      %27 = vector.load %arg2[%26, %c0_11, %c0_12] : memref<8x2x128xf32, #tpu.memory_space<vmem>>, vector<1x2x128xf32>
      %28 = vector.shape_cast %27 : vector<1x2x128xf32> to vector<2x128xf32>
      %29 = arith.index_cast %24 : i32 to index
      %c0_13 = arith.constant 0 : index
      %c0_14 = arith.constant 0 : index
      %30 = vector.load %arg2[%29, %c0_13, %c0_14] : memref<8x2x128xf32, #tpu.memory_space<vmem>>, vector<1x2x128xf32>
      %31 = vector.shape_cast %30 : vector<1x2x128xf32> to vector<2x128xf32>
      %32 = arith.select %18, %28, %31 : vector<2x128xi1>, vector<2x128xf32>
      %cst_15 = arith.constant dense<0.000000e+00> : vector<2x128xf32>
      %33 = tpu.matmul %25, %3, %cst_15 {dimension_numbers = #tpu.dot_dimension_numbers<[1], [0], [0], [1], [0, 0, 1, 1], [], []>} : vector<2x32xf32>, vector<32x128xf32>, vector<2x128xf32> -> vector<2x128xf32>
      %34 = arith.addf %32, %33 : vector<2x128xf32>
      %35 = vector.extract_strided_slice %34 {offsets = [0, 0], sizes = [2, 16], strides = [1, 1]} : vector<2x128xf32> to vector<2x16xf32>
      %36 = arith.negf %35 : vector<2x16xf32>
      %37 = math.exp %36 : vector<2x16xf32>
      %cst_16 = arith.constant 1.000000e+00 : f32
      %38 = vector.broadcast %cst_16 : f32 to vector<2x16xf32>
      %39 = arith.addf %38, %37 : vector<2x16xf32>
      %40 = arith.divf %38, %39 : vector<2x16xf32>
      %41 = vector.extract_strided_slice %34 {offsets = [0, 16], sizes = [2, 16], strides = [1, 1]} : vector<2x128xf32> to vector<2x16xf32>
      %42 = arith.negf %41 : vector<2x16xf32>
      %43 = math.exp %42 : vector<2x16xf32>
      %cst_17 = arith.constant 1.000000e+00 : f32
      %44 = vector.broadcast %cst_17 : f32 to vector<2x16xf32>
      %45 = arith.addf %44, %43 : vector<2x16xf32>
      %46 = arith.divf %44, %45 : vector<2x16xf32>
      %47 = vector.extract_strided_slice %34 {offsets = [0, 32], sizes = [2, 16], strides = [1, 1]} : vector<2x128xf32> to vector<2x16xf32>
      %48 = math.tanh %47 : vector<2x16xf32>
      %49 = vector.extract_strided_slice %34 {offsets = [0, 48], sizes = [2, 16], strides = [1, 1]} : vector<2x128xf32> to vector<2x16xf32>
      %50 = arith.negf %49 : vector<2x16xf32>
      %51 = math.exp %50 : vector<2x16xf32>
      %cst_18 = arith.constant 1.000000e+00 : f32
      %52 = vector.broadcast %cst_18 : f32 to vector<2x16xf32>
      %53 = arith.addf %52, %51 : vector<2x16xf32>
      %54 = arith.divf %52, %53 : vector<2x16xf32>
      %55 = arith.mulf %46, %arg7 : vector<2x16xf32>
      %56 = arith.mulf %40, %48 : vector<2x16xf32>
      %57 = arith.addf %55, %56 : vector<2x16xf32>
      %58 = math.tanh %57 : vector<2x16xf32>
      %59 = arith.mulf %54, %58 : vector<2x16xf32>
      %60 = vector.broadcast %arg5 : i32 to vector<2x16xi32>
      %61 = arith.cmpi sgt, %15, %60 : vector<2x16xi32>
      %62 = arith.select %61, %59, %arg6 : vector<2x16xi1>, vector<2x16xf32>
      %63 = arith.select %61, %57, %arg7 : vector<2x16xi1>, vector<2x16xf32>
      %cst_19 = arith.constant 0.000000e+00 : f32
      %64 = vector.broadcast %cst_19 : f32 to vector<2x16xf32>
      %65 = arith.select %61, %62, %64 : vector<2x16xi1>, vector<2x16xf32>
      %66 = arith.index_cast %arg5 : i32 to index
      %c0_20 = arith.constant 0 : index
      %c0_21 = arith.constant 0 : index
      %67 = vector.load %arg4[%66, %c0_20, %c0_21] : memref<8x2x32xf32, #tpu.memory_space<vmem>>, vector<1x2x16xf32>
      %68 = vector.shape_cast %67 : vector<1x2x16xf32> to vector<2x16xf32>
      %69 = vector.shape_cast %65 : vector<2x16xf32> to vector<1x2x16xf32>
      tpu.vector_store %arg4[%66, %c0_20, %c0_21], %69 {strides = array<i32>} : memref<8x2x32xf32, #tpu.memory_space<vmem>>, vector<1x2x16xf32>,
      %70 = vector.extract_strided_slice %34 {offsets = [0, 64], sizes = [2, 16], strides = [1, 1]} : vector<2x128xf32> to vector<2x16xf32>
      %71 = arith.negf %70 : vector<2x16xf32>
      %72 = math.exp %71 : vector<2x16xf32>
      %cst_22 = arith.constant 1.000000e+00 : f32
      %73 = vector.broadcast %cst_22 : f32 to vector<2x16xf32>
      %74 = arith.addf %73, %72 : vector<2x16xf32>
      %75 = arith.divf %73, %74 : vector<2x16xf32>
      %76 = vector.extract_strided_slice %34 {offsets = [0, 80], sizes = [2, 16], strides = [1, 1]} : vector<2x128xf32> to vector<2x16xf32>
      %77 = arith.negf %76 : vector<2x16xf32>
      %78 = math.exp %77 : vector<2x16xf32>
      %cst_23 = arith.constant 1.000000e+00 : f32
      %79 = vector.broadcast %cst_23 : f32 to vector<2x16xf32>
      %80 = arith.addf %79, %78 : vector<2x16xf32>
      %81 = arith.divf %79, %80 : vector<2x16xf32>
      %82 = vector.extract_strided_slice %34 {offsets = [0, 96], sizes = [2, 16], strides = [1, 1]} : vector<2x128xf32> to vector<2x16xf32>
      %83 = math.tanh %82 : vector<2x16xf32>
      %84 = vector.extract_strided_slice %34 {offsets = [0, 112], sizes = [2, 16], strides = [1, 1]} : vector<2x128xf32> to vector<2x16xf32>
      %85 = arith.negf %84 : vector<2x16xf32>
      %86 = math.exp %85 : vector<2x16xf32>
      %cst_24 = arith.constant 1.000000e+00 : f32
      %87 = vector.broadcast %cst_24 : f32 to vector<2x16xf32>
      %88 = arith.addf %87, %86 : vector<2x16xf32>
      %89 = arith.divf %87, %88 : vector<2x16xf32>
      %90 = arith.mulf %81, %arg9 : vector<2x16xf32>
      %91 = arith.mulf %75, %83 : vector<2x16xf32>
      %92 = arith.addf %90, %91 : vector<2x16xf32>
      %93 = math.tanh %92 : vector<2x16xf32>
      %94 = arith.mulf %89, %93 : vector<2x16xf32>
      %95 = vector.broadcast %24 : i32 to vector<2x16xi32>
      %96 = arith.cmpi sgt, %15, %95 : vector<2x16xi32>
      %97 = arith.select %96, %94, %arg8 : vector<2x16xi1>, vector<2x16xf32>
      %98 = arith.select %96, %92, %arg9 : vector<2x16xi1>, vector<2x16xf32>
      %cst_25 = arith.constant 0.000000e+00 : f32
      %99 = vector.broadcast %cst_25 : f32 to vector<2x16xf32>
      %100 = arith.select %96, %97, %99 : vector<2x16xi1>, vector<2x16xf32>
      %101 = arith.index_cast %24 : i32 to index
      %c0_26 = arith.constant 0 : index
      %c16 = arith.constant 16 : index
      %102 = vector.load %arg4[%101, %c0_26, %c16] : memref<8x2x32xf32, #tpu.memory_space<vmem>>, vector<1x2x16xf32>
      %103 = vector.shape_cast %102 : vector<1x2x16xf32> to vector<2x16xf32>
      %104 = vector.shape_cast %100 : vector<2x16xf32> to vector<1x2x16xf32>
      tpu.vector_store %arg4[%101, %c0_26, %c16], %104 {strides = array<i32>} : memref<8x2x32xf32, #tpu.memory_space<vmem>>, vector<1x2x16xf32>,
      scf.yield %62, %63, %97, %98 : vector<2x16xf32>, vector<2x16xf32>, vector<2x16xf32>, vector<2x16xf32>
    }
    return
  }
  func.func @transform_0(%arg0: i32, %arg1: memref<2xi32, #tpu.memory_space<smem>>) -> (i32, i32, i32) {
    %c0_i32 = arith.constant 0 : i32
    %c0_i32_0 = arith.constant 0 : i32
    %c0_i32_1 = arith.constant 0 : i32
    %c0_i32_2 = arith.constant 0 : i32
    return %c0_i32, %c0_i32_0, %c0_i32_1 : i32, i32, i32
  }
  func.func @transform_1(%arg0: i32, %arg1: memref<2xi32, #tpu.memory_space<smem>>) -> (i32, i32) {
    %c0_i32 = arith.constant 0 : i32
    %c0_i32_0 = arith.constant 0 : i32
    %c0_i32_1 = arith.constant 0 : i32
    return %c0_i32, %c0_i32_0 : i32, i32
  }
  func.func @transform_2(%arg0: i32, %arg1: memref<2xi32, #tpu.memory_space<smem>>) -> (i32, i32, i32) {
    %c0_i32 = arith.constant 0 : i32
    %c0_i32_0 = arith.constant 0 : i32
    %c0_i32_1 = arith.constant 0 : i32
    %c0_i32_2 = arith.constant 0 : i32
    return %c0_i32, %c0_i32_0, %c0_i32_1 : i32, i32, i32
  }
}

</mosaic_0001>

<bundles_post_ra>
// kernel: tpu_custom_call.1
= control target key start
LH: loop header
LB: loop body
LE: loop exit
PB: predicated region body
PF: predicated region fallthrough
CT: control target
= control target key end

     0   :  { %s695_s0 = inlined_call_operand.hbm [shape: s32[2], index: 0, kind: input, shape index: {}]   ;;  %s696_s1 = inlined_call_operand.hbm [shape: f32[8,2,128], index: 1, kind: input, shape index: {}]   ;;  %s697_s2 = inlined_call_operand.hbm [shape: f32[32,128], index: 2, kind: input, shape index: {}]   ;;  %s698_s3 = inlined_call_operand.hbm [shape: f32[8,2,32], index: 3, kind: output, shape index: {}]  }
   0x1   :  { %s369_s14 = scalar_lea.hbm %s695_s0, 16 }
   0x2   :  { %p370_p0 = scmp.ne.s32.totalorder %s695_s0, %s369_s14  ;;  %p373_p1 = scmp.lt.u32.totalorder %s369_s14, %s695_s0 }
   0x4   :  { %p375_p2 = pnand %p373_p1, %p370_p0 }
   0x6   :  { %378 = shalt.err (!%p375_p2)  }
   0x7   :  { %s493_s19 = smov [#allocation3]  }
   0x8   :  { %9 = dma.hbm_to_smem %s695_s0, 16, %s493_s19, [#allocation2] }
   0x9   :  { %465 = dma.done.wait [#allocation2], 16 }
   0xa   :  { %466 = vsyncadd [#allocation2], 4294967280 }
   0xb   :  { %11 = sfence }
   0xc   :  { %12 = vsyncpa [#allocation5], 0 }
   0xd   :  { %13 = vsyncpa [#allocation8], 0 }
   0xe   :  { %14 = vsyncpa [#allocation6], 0  ;;  %s494_s22 = smov [#allocation4]   ;;  %s379_s26 = scalar_lea.hbm %s696_s1, 256 }
   0xf   :  { %s20_s23 = sshll.u32 %s494_s22, 4  ;;  %p380_p3 = scmp.ne.s32.totalorder %s696_s1, %s379_s26  ;;  %s21_s23 = int_to_ptr.vmem [resolvable:$true] %s20_s23 }
  0x10   :  { %p383_p4 = scmp.lt.u32.totalorder %s379_s26, %s696_s1 }
  0x12   :  { %p385_p5 = pnand %p383_p4, %p380_p3 }
  0x14   :  { %388 = shalt.err (!%p385_p5)
}
  0x15   :  { %s389_s0 = scalar_lea.vmem %s21_s23, 256  ;;  %p394_p7 = scmp.lt.s32.totalorder %s21_s23, %s21_s23 }
  0x16   :  { %p390_p6 = scmp.ne.s32.totalorder %s21_s23, %s389_s0  ;;  %p395_p8 = scmp.lt.s32.totalorder %s389_s0, %s389_s0 }
  0x18   :  { %p396_p9 = por %p395_p8, %p394_p7 }
  0x1a   :  { %p397_p10 = pnand %p396_p9, %p390_p6 }
  0x1c   :  { %400 = shalt.err (!%p397_p10)
}
  0x1d   :  { %s495_s4 = smov 32   ;;  %s496_s5 = smov 2  }
  0x1e   :  { %26 = dma.hbm_to_vmem [thread:$0]  %s696_s1, 256, %s21_s23, [#allocation5], %s495_s4, %s495_s4, %s496_s5  }
  0x1f   :  { %s497_s8 = smov [#allocation7]   ;;  %s401_s12 = scalar_lea.hbm %s697_s2, 512 }
  0x20   :  { %s32_s9 = sshll.u32 %s497_s8, 4  ;;  %p402_p11 = scmp.ne.s32.totalorder %s697_s2, %s401_s12  ;;  %s33_s9 = int_to_ptr.vmem [resolvable:$true] %s32_s9 }
  0x21   :  { %p405_p12 = scmp.lt.u32.totalorder %s401_s12, %s697_s2 }
  0x23   :  { %p407_p13 = pnand %p405_p12, %p402_p11 }
  0x25   :  { %410 = shalt.err (!%p407_p13)
}
  0x26   :  { %s411_s17 = scalar_lea.vmem %s33_s9, 512  ;;  %p416_p1 = scmp.lt.s32.totalorder %s33_s9, %s33_s9 }
  0x27   :  { %p412_p0 = scmp.ne.s32.totalorder %s33_s9, %s411_s17  ;;  %p417_p2 = scmp.lt.s32.totalorder %s411_s17, %s411_s17 }
  0x29   :  { %p418_p3 = por %p417_p2, %p416_p1 }
  0x2b   :  { %p419_p4 = pnand %p418_p3, %p412_p0 }
  0x2d   :  { %422 = shalt.err (!%p419_p4)
}
  0x2e   :  { %s498_s1 = smov 128   ;;  %s499_s18 = smov 8  }
  0x2f   :  { %38 = dma.hbm_to_vmem [thread:$0]  %s697_s2, 512, %s33_s9, [#allocation8], %s498_s1, %s498_s1, %s499_s18  }
  0x30   :  { %467 = dma.done.wait [#allocation5], 256  }
  0x31   :  { %468 = vsyncadd [#allocation5], 4294967040 }
  0x32   :  { %469 = dma.done.wait [#allocation8], 512  }
  0x33   :  { %470 = vsyncadd [#allocation8], 4294966784  ;;  %v59_v0 = vlaneseq  ;;  %vm45_vm0 = vcmask 254976   ;;  %s568_s21 = sld [smem:[#allocation3]]  ;;  %s274_s22 = sld [smem:[#allocation3 + $0x1]]  ;;  %v500_v1 = vmov 0.0  }
  0x34   :  { %46 = vst.msk [vmem:[#allocation9] sm:$0x3] %vm45_vm0, %v500_v1  ;;  %47 = vst.msk [vmem:[#allocation9 + $0x2] sm:$0x3] %vm45_vm0, %v500_v1  ;;  %v573_v4 = vld [vmem:[#allocation7] sm:$0xff]  ;;  %v575_v5 = vld [vmem:[#allocation7 + $0x8] sm:$0xff] }
  0x35   :  { %48 = vst.msk [vmem:[#allocation9 + $0x4] sm:$0x3] %vm45_vm0, %v500_v1  ;;  %49 = vst.msk [vmem:[#allocation9 + $0x6] sm:$0x3] %vm45_vm0, %v500_v1  ;;  %v60_v2 = vshrl.u32 %v59_v0, 7  ;;  %v570_v3 = vand.u32 127, %v59_v0 }
  0x36   :  { %50 = vst.msk [vmem:[#allocation9 + $0x8] sm:$0x3] %vm45_vm0, %v500_v1  ;;  %51 = vst.msk [vmem:[#allocation9 + $0xa] sm:$0x3] %vm45_vm0, %v500_v1  ;;  %v577_v6 = vld [vmem:[#allocation7 + $0x10] sm:$0xff]  ;;  %v580_v9 = vld [vmem:[#allocation7 + $0x18] sm:$0xff] }
  0x37   :  { %52 = vst.msk [vmem:[#allocation9 + $0xc] sm:$0x3] %vm45_vm0, %v500_v1  ;;  %53 = vst.msk [vmem:[#allocation9 + $0xe] sm:$0x3] %vm45_vm0, %v500_v1  ;;  %vm70_vm1 = vcmp.lt.s32.totalorder %v570_v3, 64  ;;  %vm61_vm2 = vcmp.eq.s32.totalorder %v60_v2, 0 }
  0x38   :  { %vm64_vm3 = vcmp.eq.s32.totalorder %v60_v2, 1 }
  0x39   :  { %v62_v7 = vstv %s568_s21  ;;  %v66_v8 = vstv %s274_s22  ;;  %p275_p5 = scmp.le.s32.totalorder %s568_s21, 0 }
  0x3a   :  { %v63_v10 = vsel %vm61_vm2, %v62_v7, 0  ;;  %v585_v12 = vmov (!%p275_p5), 0.0   ;;  %v587_v13 = vmov (!%p275_p5), 0.0   ;;  %v589_v14 = vmov (!%p275_p5), 0.0   ;;  %s593_s2 = smov (!%p275_p5), 0  }
  0x3b   :  { %v582_v11 = vsel %vm64_vm3, %v66_v8, %v63_v10  ;;  %263 = sbr.rel (%p275_p5) target bundleno = 892 (0x37c), region = 41  ;;  %v591_v15 = vmov (!%p275_p5), 0.0  }
  0x42 LB: > { %v298_v16 = vpack.c.bf16 %v575_v5, %v573_v4  ;;  %v501_v17 = vmov 0.0|0.0   ;;  %s502_s23 = smov 80   ;;  %v301_v18 = vpack.c.bf16 %v580_v9, %v577_v6  ;;  %vm503_vm4 = vmmov 0   ;;  %s505_s24 = smov 32   ;;  %s491_s2 = sphi %s593_s2, %s74_s2   ;;  %v487_v15 = vphi %v591_v15, %v201_v15   ;;  %v483_v14 = vphi %v589_v14, %v202_v14   ;;  %v479_v13 = vphi %v587_v13, %v221_v13   ;;  %v475_v12 = vphi %v585_v12, %v222_v12  }
  0x43   : > { %297 = vmatprep.subr.bf16.mxu0 %v501_v17  ;;  %84 = vrot.lane.b32.xlu0 %v487_v15, %s502_s23  ;;  %v504_v19 = vmov 0.0   ;;  %vm91_vm5 = vcmask 130048   ;;  %vm100_vm6 = vcmask 261120   ;;  %s276_s25 = sadd.s32 4294967295, %s568_s21  ;;  %s277_s27 = sshll.u32 %s491_s2, 1  ;;  %v199_v36 = vstv %s491_s2 }
  0x44   : > { %299 = vmatpush3.bf16.msra.mxu0 %v298_v16  ;;  %294 = vmatprep.mubr.msk.f32.mxu0 %vm503_vm4, %v504_v19  ;;  %s620_s26 = ssub.s32 %s276_s25, %s491_s2  ;;  %s94_s29 = scalar_lea.vmem [#allocation4], %s277_s27  ;;  %vm635_vm7 = vcmp.gt.s32.totalorder %v582_v11, %v199_v36  ;;  %vm209_vm9 = vcmask 123904   ;;  %vm229_vm10 = vcmask 255104  }
  0x45   : > { %300 = vmatprep.subr.bf16.mxu0 %v501_v17  ;;  %s278_s28 = sshll.u32 %s620_s26, 1  ;;  %v95_v23 = vld [vmem:[%s94_s29] sm:$0x3]  ;;  %s506_s0 = smov 96   ;;  %v219_v37 = vstv %s620_s26 }
  0x46   : > { %s97_s30 = scalar_lea.vmem [#allocation4], %s278_s28  ;;  %s507_s6 = smov 16   ;;  %vm640_vm8 = vcmp.gt.s32.totalorder %v582_v11, %v219_v37 }
  0x47   : > { %88 = vrot.lane.b32.xlu0 %v479_v13, %s505_s24  ;;  %v98_v24 = vld [vmem:[%s97_s30] sm:$0x3]  ;;  %s208_s7 = scalar_lea.vmem [#allocation9], %s277_s27  ;;  %s228_s8 = scalar_lea.vmem [#allocation9], %s278_s28 }
  0x48   : > { %302 = vmatpush3.bf16.msra.mxu0 %v301_v18  ;;  %v99_v25 = vsel %vm70_vm1, %v95_v23, %v98_v24  ;;  %s74_s2 = sadd.s32 1, %s491_s2  }
  0x49   : > { %p73_p6 = scmp.ge.s32.totalorder %s74_s2, %s568_s21 }
  0xb5   : > { %v85_v20 = vpop.permute.xlu0 %84 }
  0xb9   : > { %v89_v21 = vpop.permute.xlu0 %88 }
  0xba   : > { %v92_v22 = vsel %vm91_vm5, %v85_v20, %v89_v21 }
  0xbb   : > { %295 = vmatmul.mubr.msk.f32.vlgmr.msra.gmra.mrb[0].mxu0 %vm100_vm6, %v92_v22 }
 0x18e   : > { %v170_v26 = vpop.f32.mrb[0].mxu0 }
 0x18f   : > { %v174_v27 = vadd.f32 %v170_v26, %v99_v25  ;;  %v296_v28 = vpop.f32.mrb[1].mxu0 }
 0x191   : > { %359 = vtanh.f32 %v174_v27  ;;  %v280_v30 = vmul.f32 -1.442695, %v174_v27 }
 0x193   : > { %361 = vpow2.f32 %v280_v30 }
 0x19b   : > { %v360_v29 = vpop.eup %359 }
 0x19c   : > { %184 = vrot.lane.b32.xlu1 %v360_v29, %s506_s0 }
 0x19d   : > { %v362_v31 = vpop.eup %361 }
 0x19e   : > { %v178_v32 = vadd.f32 1.0, %v362_v31 }
 0x1a0   : > { %363 = vrcp.f32 %v178_v32 }
 0x1aa   : > { %v364_v33 = vpop.eup %363 }
 0x1ab   : > { %v182_v38 = vmul.f32 %v483_v14, %v364_v33  ;;  %v211_v39 = vmul.f32 %v475_v12, %v364_v33 }
 0x20e   : > { %v185_v34 = vpop.permute.xlu1 %184 }
 0x20f   : > { %v187_v35 = vmul.f32 %v364_v33, %v185_v34 }
 0x211   : > { %189 = vrot.lane.b32.xlu1 %v187_v35, %s507_s6 }
 0x283   : > { %v190_v40 = vpop.permute.xlu1 %189 }
 0x284   : > { %v192_v43 = vadd.f32 %v190_v40, %v182_v38  ;;  %v212_v44 = vadd.f32 %v211_v39, %v190_v40 }
 0x286   : > { %365 = vtanh.f32 %v192_v43  ;;  %v202_v14 = vsel %vm635_vm7, %v192_v43, %v483_v14   ;;  %v222_v12 = vsel %vm640_vm8, %v212_v44, %v475_v12  }
 0x287   : > { %367 = vtanh.f32 %v212_v44 }
 0x290   : > { %v366_v45 = vpop.eup %365 }
 0x291   : > { %v368_v46 = vpop.eup %367  ;;  %195 = vrot.lane.b32.xlu0 %v366_v45, %s505_s24 }
 0x292   : > { %215 = vrot.lane.b32.xlu1 %v368_v46, %s505_s24 }
 0x303   : > { %v196_v47 = vpop.permute.xlu0 %195 }
 0x304   : > { %v198_v48 = vmul.f32 %v364_v33, %v196_v47  ;;  %v216_v49 = vpop.permute.xlu1 %215 }
 0x305   : > { %v218_v50 = vmul.f32 %v364_v33, %v216_v49 }
 0x306   : > { %v203_v51 = vsel %vm635_vm7, %v198_v48, 0.0  ;;  %v201_v15 = vsel %vm635_vm7, %v198_v48, %v487_v15  }
 0x307   : > { %205 = vrot.lane.b32.xlu0 %v203_v51, %s502_s23  ;;  %v223_v52 = vsel %vm640_vm8, %v218_v50, 0.0  ;;  %v221_v13 = vsel %vm640_vm8, %v218_v50, %v479_v13  }
 0x308   : > { %225 = vrot.lane.b32.xlu1 %v223_v52, %s505_s24 }
 0x375   :  { %76 = sbr.rel (!%p73_p6) target bundleno = 66 (0x42), region = 47 }
 0x379   : > { %v206_v53 = vpop.permute.xlu0 %205 }
 0x37a   : > { %210 = vst.msk [vmem:[%s208_s7] sm:$0x3] %vm209_vm9, %v206_v53  ;;  %v226_v54 = vpop.permute.xlu1 %225 }
 0x37b   : > { %230 = vst.msk [vmem:[%s228_s8] sm:$0x3] %vm229_vm10, %v226_v54 }
 0x37c PF:  { %s508_s9 = smov [#allocation9]  }
 0x37d   :  { %s236_s10 = sshll.u32 %s508_s9, 4  ;;  %s237_s10 = int_to_ptr.vmem [resolvable:$true] %s236_s10 }
 0x37e   :  { %s423_s11 = scalar_lea.vmem %s237_s10, 256  ;;  %p428_p8 = scmp.lt.s32.totalorder %s237_s10, %s237_s10 }
 0x37f   :  { %p424_p7 = scmp.ne.s32.totalorder %s237_s10, %s423_s11  ;;  %p429_p9 = scmp.lt.s32.totalorder %s423_s11, %s423_s11 }
 0x381   :  { %p430_p10 = por %p429_p9, %p428_p8 }
 0x383   :  { %p431_p11 = pnand %p430_p10, %p424_p7 }
 0x385   :  { %434 = shalt.err (!%p431_p11)
}
 0x386   :  { %s435_s14 = scalar_lea.hbm %s698_s3, 256 }
 0x387   :  { %p436_p12 = scmp.ne.s32.totalorder %s698_s3, %s435_s14  ;;  %p439_p13 = scmp.lt.u32.totalorder %s435_s14, %s698_s3 }
 0x389   :  { %p441_p0 = pnand %p439_p13, %p436_p12 }
 0x38b   :  { %444 = shalt.err (!%p441_p0)
}
 0x38c   :  { %242 = dma.vmem_to_hbm [thread:$0]  %s237_s10, 256, %s698_s3, [#allocation6], %s495_s4, %s495_s4, %s496_s5  }
 0x38d   :  { %471 = dma.done.wait [#allocation6], 256  }
 0x38e   :  { %472 = vsyncadd [#allocation6], 4294967040 }
 0x38f   :  { %246 = vsyncpa [#allocation5], 1 }
 0x390   :  { %247 = vsyncpa [#allocation8], 1 }
 0x391   :  { %248 = vsyncpa [#allocation6], 1 }

</bundles_post_ra>
